<compile_context>
chip_gen: v6e
topology: v6e:2x2x1
jax: 0.10.0
libtpu: 0.0.40
codegen_flags: <defaults>
</compile_context>

<pallas_src>
import functools

import jax
import jax.numpy as jnp
from jax.experimental import pallas as pl
from jax.experimental.pallas import tpu as pltpu


def _round_up(x, m):
    return pl.cdiv(x, m) * m


# ---------------------------------------------------------------------------
# Kernel
# ---------------------------------------------------------------------------
def embedder_kernel(pos_ref, ner_ref, val_ref, table_t_ref, out_ref, *, V1, V2):
    """Fused block-diagonal one-hot matmul for one token tile.

    pos_ref     : [1, TILE] int32   'pos' tag ids
    ner_ref     : [1, TILE] int32   'ner' tag ids
    val_ref     : [1, TILE] float32 raw values of the need_emb=False tag
    table_t_ref : [D_pad, K_pad] float32 block-diag table, transposed (resident)
    out_ref     : [D_pad, TILE]     concatenated embeddings (token on lanes)
    """
    K_pad = table_t_ref.shape[1]
    tile = out_ref.shape[1]

    pos = pos_ref[...]            # [1, TILE] i32, sublane-broadcast in compares
    ner = ner_ref[...]            # [1, TILE] i32
    vals = val_ref[...]           # [1, TILE] f32

    # Row index along the fused K axis.  Regenerated per grid step on purpose:
    # iota is ~1 VPU op per vreg, cheaper than keeping a [K_pad, TILE]
    # constant resident in VMEM.
    iota_k = jax.lax.broadcasted_iota(jnp.int32, (K_pad, tile), 0)

    # Combined MXU operand [K_pad, TILE]:
    #   rows 0..V1-1      : one-hot of pos ids
    #   rows V1..V1+V2-1  : one-hot of ner ids (offset by V1)
    #   row  V1+V2        : raw values (pass-through column)
    #   rows beyond       : zero (K padding)
    # Sum of two float one-hots (hot ranges are disjoint) instead of
    # bool-OR + convert: one fewer VPU op per vreg (v7x VALU trim).
    onehot = ((iota_k == pos).astype(jnp.float32)
              + (iota_k == (ner + V1)).astype(jnp.float32))
    combined = jnp.where(iota_k == (V1 + V2), vals, onehot)

    # F.dropout(..., training=False) is the identity -> nothing to do.
    # TODO(synk): training-mode dropout would use pltpu.prng_seed / prng_random_bits.

    # Single MXU push: [D_pad, K_pad] @ [K_pad, TILE] -> [D_pad, TILE].
    # MXU is nowhere near the bottleneck; default precision validated at 1e-5.
    res = jnp.dot(table_t_ref[...], combined, preferred_element_type=jnp.float32)
    out_ref[...] = res.astype(out_ref.dtype)


# ---------------------------------------------------------------------------
# One-time setup (hoisted out of the per-call path, per review)
# ---------------------------------------------------------------------------
def build_packed_table(pos_emb, ner_emb):
    """Build the transposed block-diagonal table ONCE at embedder construction.

    Returns table_t of shape [D_pad, K_pad] (f32), where
      K_pad = round_up(V1 + V2 + 1, 8), D_pad = round_up(D1 + D2 + 1, 8).
    Zero padding rows/cols contribute nothing to the matmul.
    """
    V1, D1 = pos_emb.shape
    V2, D2 = ner_emb.shape
    K_total = V1 + V2 + 1
    D_total = D1 + D2 + 1
    K_pad = _round_up(K_total, 8)
    D_pad = _round_up(D_total, 8)

    table = jnp.zeros((K_pad, D_pad), jnp.float32)
    table = table.at[:V1, :D1].set(pos_emb.astype(jnp.float32))
    table = table.at[V1:V1 + V2, D1:D1 + D2].set(ner_emb.astype(jnp.float32))
    table = table.at[V1 + V2, D1 + D2].set(1.0)   # pass-through for raw values
    return table.T                                 # [D_pad, K_pad]


# ---------------------------------------------------------------------------
# Fast path: returns the kernel-native layout, no post-kernel HBM pass
# ---------------------------------------------------------------------------
def embedder_forward_packed(pos_ids, ner_ids, vals, table_t, *, V1, V2,
                            row_tile=4096, out_dtype=jnp.float32):
    """
    pos_ids, ner_ids : [B, S] int32 id tensors
    vals             : [B, S] float32 raw values (tag with need_emb=False)
    table_t          : [D_pad, K_pad] f32 from build_packed_table (static weights)
    returns          : [D_pad, N_pad]  (token-on-lanes; rows 0..D_total-1 are the
                       concatenated embeddings, remaining rows are zero padding;
                       columns beyond B*S are padding).  Consumers slice lazily.
    """
    B, S = pos_ids.shape
    N = B * S
    D_pad, K_pad = table_t.shape

    # --- tile sizing -------------------------------------------------------
    # Multiple of 128 for lane-dense stores (review correctness concern #2).
    row_tile = _round_up(max(int(row_tile), 128), 128)
    n128 = _round_up(N, 128)
    tile = min(row_tile, n128)
    # If everything fits one tile but there are >=256 tokens, split into two
    # tiles so the "parallel" grid can be sharded across both v7x TensorCores.
    if tile == n128 and n128 >= 256:
        tile = _round_up(pl.cdiv(n128, 2), 128)
    n_tiles = pl.cdiv(N, tile)
    N_pad = n_tiles * tile

    # --- inputs: three flat [1, N] arrays, pad only when needed ------------
    pos = pos_ids.reshape(1, N).astype(jnp.int32)
    ner = ner_ids.reshape(1, N).astype(jnp.int32)
    val = vals.reshape(1, N).astype(jnp.float32)
    if N_pad != N:
        pad = ((0, 0), (0, N_pad - N))
        pos = jnp.pad(pos, pad)
        ner = jnp.pad(ner, pad)
        val = jnp.pad(val, pad)

    kernel = functools.partial(embedder_kernel, V1=V1, V2=V2)

    return pl.pallas_call(
        kernel,
        out_shape=jax.ShapeDtypeStruct((D_pad, N_pad), out_dtype),
        grid=(n_tiles,),
        in_specs=[
            pl.BlockSpec((1, tile), lambda i: (0, i)),        # pos ids
            pl.BlockSpec((1, tile), lambda i: (0, i)),        # ner ids
            pl.BlockSpec((1, tile), lambda i: (0, i)),        # raw values
            pl.BlockSpec((D_pad, K_pad), lambda i: (0, 0)),   # table stays resident
        ],
        out_specs=pl.BlockSpec((D_pad, tile), lambda i: (0, i)),
        compiler_params=pltpu.CompilerParams(
            dimension_semantics=("parallel",)),
    )(pos, ner, val, table_t)


# ---------------------------------------------------------------------------
# Torch-layout compatibility wrapper (exact module semantics)
# ---------------------------------------------------------------------------
def embedder_forward(pos_ids, ner_ids, vals, table_t, *, D_total, V1, V2,
                     row_tile=4096):
    """Returns [B, S, D_total] float32 exactly like Embedder.forward.

    Perf note (review item 1): the slice+transpose below is an extra full HBM
    read+write of the output.  Performance-critical consumers should call
    embedder_forward_packed() and consume the native [D_pad, N] layout
    directly, slicing to D_total lazily.
    """
    B, S = pos_ids.shape
    N = B * S
    packed = embedder_forward_packed(pos_ids, ner_ids, vals, table_t,
                                     V1=V1, V2=V2, row_tile=row_tile)
    return packed[:D_total, :N].T.reshape(B, S, D_total)


if __name__ == "__main__":
    # Small shapes consistent with the module: batch=2, seq=8.
    B, S = 2, 8
    V1, D1 = 32, 16   # 'pos' tag
    V2, D2 = 16, 8    # 'ner' tag
    D_total = D1 + D2 + 1
    N = B * S

    key = jax.random.PRNGKey(0)
    k1, k2, k3, k4, k5 = jax.random.split(key, 5)

    # Deterministic synthetic "emb_mats" (nn.Embedding.from_pretrained equivalents).
    pos_emb = jax.random.normal(k1, (V1, D1), dtype=jnp.float32)
    ner_emb = jax.random.normal(k2, (V2, D2), dtype=jnp.float32)

    # Deterministic synthetic batch.
    pos_ids = jax.random.randint(k3, (B, S), 0, V1, dtype=jnp.int32)
    ner_ids = jax.random.randint(k4, (B, S), 0, V2, dtype=jnp.int32)
    vals = jax.random.uniform(k5, (B, S), dtype=jnp.float32)

    # Static weights -> table built once (hoisted out of the per-call path).
    table_t = build_packed_table(pos_emb, ner_emb)
    D_pad = table_t.shape[0]

    # Reference (plain JAX) check of the concat-of-embeddings semantics.
    ref = jnp.concatenate(
        [jnp.take(pos_emb, pos_ids, axis=0),
         jnp.take(ner_emb, ner_ids, axis=0),
         vals[..., None]],
        axis=-1,
    )                                                   # [B, S, D_total]

    # --- fast path: native packed layout, no post-kernel HBM pass ----------
    out_packed = embedder_forward_packed(pos_ids, ner_ids, vals, table_t,
                                         V1=V1, V2=V2)
    out_packed = jax.block_until_ready(out_packed)
    assert out_packed.shape[0] == D_pad and out_packed.shape[1] >= N, out_packed.shape
    ref_packed = ref.reshape(N, D_total).T              # [D_total, N] (test-side only)
    assert jnp.allclose(out_packed[:D_total, :N], ref_packed, atol=1e-5, rtol=1e-5)
    assert jnp.all(out_packed[D_total:, :N] == 0.0)     # feature padding rows are zero

    # --- torch-compatible [B, S, D_total] wrapper ---------------------------
    out_bsd = embedder_forward(pos_ids, ner_ids, vals, table_t,
                               D_total=D_total, V1=V1, V2=V2)
    out_bsd = jax.block_until_ready(out_bsd)
    assert out_bsd.shape == (B, S, D_total), out_bsd.shape
    assert jnp.allclose(out_bsd, ref, atol=1e-5, rtol=1e-5)

    print("KERNEL_OK")
</pallas_src>

<mosaic_0001>
module attributes {stable_mosaic.version = 11 : i64} {
  func.func @embedder_kernel(%arg0: i32, %arg1: memref<1x128xi32, #tpu.memory_space<vmem>>, %arg2: memref<1x128xi32, #tpu.memory_space<vmem>>, %arg3: memref<1x128xf32, #tpu.memory_space<vmem>>, %arg4: memref<32x56xf32, #tpu.memory_space<vmem>>, %arg5: memref<32x128xf32, #tpu.memory_space<vmem>>) attributes {dimension_semantics = [#tpu.dimension_semantics<parallel>], iteration_bounds = array<i64: 1>, scalar_prefetch = 0 : i64, scratch_operands = 0 : i64, tpu.core_type = #tpu.core_type<tc>, window_params = [{transform_indices = @transform_0, window_bounds = array<i64: 1, 128>}, {transform_indices = @transform_1, window_bounds = array<i64: 1, 128>}, {transform_indices = @transform_2, window_bounds = array<i64: 1, 128>}, {pipeline_mode = #tpu.pipeline_mode<synchronous>, transform_indices = @transform_3, window_bounds = array<i64: 32, 56>}, {transform_indices = @transform_4, window_bounds = array<i64: 32, 128>}]} {
    %c0 = arith.constant 0 : index
    %c0_0 = arith.constant 0 : index
    %0 = vector.load %arg1[%c0, %c0_0] : memref<1x128xi32, #tpu.memory_space<vmem>>, vector<1x128xi32>
    %c0_1 = arith.constant 0 : index
    %c0_2 = arith.constant 0 : index
    %1 = vector.load %arg2[%c0_1, %c0_2] : memref<1x128xi32, #tpu.memory_space<vmem>>, vector<1x128xi32>
    %c0_3 = arith.constant 0 : index
    %c0_4 = arith.constant 0 : index
    %2 = vector.load %arg3[%c0_3, %c0_4] : memref<1x128xf32, #tpu.memory_space<vmem>>, vector<1x128xf32>
    %3 = tpu.iota {dimensions = array<i32: 0>} : vector<56x128xi32>
    %4 = vector.broadcast %0 : vector<1x128xi32> to vector<56x128xi32>
    %5 = arith.cmpi eq, %3, %4 : vector<56x128xi32>
    %6 = arith.extui %5 : vector<56x128xi1> to vector<56x128xi32>
    %7 = arith.sitofp %6 : vector<56x128xi32> to vector<56x128xf32>
    %c32_i32 = arith.constant 32 : i32
    %8 = vector.broadcast %c32_i32 : i32 to vector<1x128xi32>
    %9 = arith.addi %1, %8 : vector<1x128xi32>
    %10 = vector.broadcast %9 : vector<1x128xi32> to vector<56x128xi32>
    %11 = arith.cmpi eq, %3, %10 : vector<56x128xi32>
    %12 = arith.extui %11 : vector<56x128xi1> to vector<56x128xi32>
    %13 = arith.sitofp %12 : vector<56x128xi32> to vector<56x128xf32>
    %14 = arith.addf %7, %13 : vector<56x128xf32>
    %c48_i32 = arith.constant 48 : i32
    %15 = vector.broadcast %c48_i32 : i32 to vector<56x128xi32>
    %16 = arith.cmpi eq, %3, %15 : vector<56x128xi32>
    %17 = vector.shape_cast %2 : vector<1x128xf32> to vector<1x128xf32>
    %18 = vector.broadcast %17 : vector<1x128xf32> to vector<56x128xf32>
    %19 = arith.select %16, %18, %14 : vector<56x128xi1>, vector<56x128xf32>
    %c0_5 = arith.constant 0 : index
    %c0_6 = arith.constant 0 : index
    %20 = vector.load %arg4[%c0_5, %c0_6] : memref<32x56xf32, #tpu.memory_space<vmem>>, vector<32x56xf32>
    %cst = arith.constant dense<0.000000e+00> : vector<32x128xf32>
    %21 = tpu.matmul %20, %19, %cst {dimension_numbers = #tpu.dot_dimension_numbers<[1], [0], [0], [1], [0, 0, 1, 1], [], []>} : vector<32x56xf32>, vector<56x128xf32>, vector<32x128xf32> -> vector<32x128xf32>
    %c0_7 = arith.constant 0 : index
    %c0_8 = arith.constant 0 : index
    %22 = vector.load %arg5[%c0_7, %c0_8] : memref<32x128xf32, #tpu.memory_space<vmem>>, vector<32x128xf32>
    tpu.vector_store %arg5[%c0_7, %c0_8], %21 {strides = array<i32>} : memref<32x128xf32, #tpu.memory_space<vmem>>, vector<32x128xf32>,
    return
  }
  func.func @transform_0(%arg0: i32) -> (i32, i32) {
    %c0_i32 = arith.constant 0 : i32
    %c0_i32_0 = arith.constant 0 : i32
    return %c0_i32, %arg0 : i32, i32
  }
  func.func @transform_1(%arg0: i32) -> (i32, i32) {
    %c0_i32 = arith.constant 0 : i32
    %c0_i32_0 = arith.constant 0 : i32
    return %c0_i32, %arg0 : i32, i32
  }
  func.func @transform_2(%arg0: i32) -> (i32, i32) {
    %c0_i32 = arith.constant 0 : i32
    %c0_i32_0 = arith.constant 0 : i32
    return %c0_i32, %arg0 : i32, i32
  }
  func.func @transform_3(%arg0: i32) -> (i32, i32) {
    %c0_i32 = arith.constant 0 : i32
    %c0_i32_0 = arith.constant 0 : i32
    %c0_i32_1 = arith.constant 0 : i32
    return %c0_i32, %c0_i32_0 : i32, i32
  }
  func.func @transform_4(%arg0: i32) -> (i32, i32) {
    %c0_i32 = arith.constant 0 : i32
    %c0_i32_0 = arith.constant 0 : i32
    return %c0_i32, %arg0 : i32, i32
  }
}

</mosaic_0001>

<bundles_post_ra>
// kernel: tpu_custom_call.1
= control target key start
LH: loop header
LB: loop body
LE: loop exit
PB: predicated region body
PF: predicated region fallthrough
CT: control target
= control target key end

     0   :  { %9 = vsyncpa [#allocation3], 0  ;;  %s462_s0 = inlined_call_operand.hbm [shape: s32[1,128], index: 0, kind: input, shape index: {}]   ;;  %s463_s1 = inlined_call_operand.vmem [shape: s32[1,128], index: 1, kind: input, shape index: {}]   ;;  %s464_s2 = inlined_call_operand.vmem [shape: f32[1,128], index: 2, kind: input, shape index: {}]   ;;  %s465_s3 = inlined_call_operand.hbm [shape: f32[32,56], index: 3, kind: input, shape index: {}]   ;;  %s466_s4 = inlined_call_operand.hbm [shape: f32[32,128], index: 4, kind: output, shape index: {}]  }
   0x1   :  { %10 = vsyncpa [#allocation6], 0 }
   0x2   :  { %11 = vsyncpa [#allocation4], 0  ;;  %s394_s15 = smov [#allocation2]   ;;  %s395_s17 = smov [#allocation5]  }
   0x3   :  { %s18_s16 = sshll.u32 %s394_s15, 4  ;;  %s31_s18 = sshll.u32 %s395_s17, 4  ;;  %s19_s16 = int_to_ptr.vmem [resolvable:$true] %s18_s16  ;;  %s32_s18 = int_to_ptr.vmem [resolvable:$true] %s31_s18 }
   0x4   :  { %s336_s19 = scalar_lea.vmem %s19_s16, 16  ;;  %s340_s20 = scalar_lea.vmem %s19_s16, 32 }
   0x5   :  { %p337_p0 = scmp.ne.s32.totalorder %s19_s16, %s336_s19  ;;  %p341_p1 = scmp.lt.s32.totalorder %s19_s16, %s19_s16 }
   0x6   :  { %p342_p2 = scmp.lt.s32.totalorder %s340_s20, %s336_s19 }
   0x8   :  { %p343_p3 = por %p342_p2, %p341_p1 }
   0xa   :  { %p344_p4 = pnand %p343_p3, %p337_p0 }
   0xc   :  { %347 = shalt.err (!%p344_p4)
}
   0xd   :  { %21 = dma.hbm_to_vmem [thread:$0]  %s462_s0, 16, %s19_s16, [#allocation3]  }
   0xe   :  { %s356_s23 = scalar_lea.vmem %s32_s18, 512  ;;  %p361_p6 = scmp.lt.s32.totalorder %s32_s18, %s32_s18 }
   0xf   :  { %p357_p5 = scmp.ne.s32.totalorder %s32_s18, %s356_s23  ;;  %p362_p7 = scmp.lt.s32.totalorder %s356_s23, %s356_s23 }
  0x11   :  { %p363_p8 = por %p362_p7, %p361_p6 }
  0x13   :  { %p364_p9 = pnand %p363_p8, %p357_p5 }
  0x15   :  { %367 = shalt.err (!%p364_p9)
}
  0x16   :  { %s396_s24 = smov 128   ;;  %s397_s25 = smov 8  }
  0x17   :  { %37 = dma.hbm_to_vmem [thread:$0]  %s465_s3, 512, %s32_s18, [#allocation6], %s396_s24, %s396_s24, %s397_s25  }
  0x18   :  { %388 = dma.done.wait [#allocation3], 16  }
  0x19   :  { %389 = vsyncadd [#allocation3], 4294967280 }
  0x1a   :  { %390 = dma.done.wait [#allocation6], 512  }
  0x1b   :  { %391 = vsyncadd [#allocation6], 4294966784  ;;  %v47_v0 = vlaneseq  ;;  %vm137_vm0 = vcmask 457728   ;;  %v257_v5 = vld [vmem:[#allocation2] ss:$0 sm:$0xff]  ;;  %v133_v9 = vld [vmem:[#allocation5] sm:$0xff] }
  0x1c   :  { %v45_v6 = vld [vmem:[%s463_s1] sm:$0x1]  ;;  %v135_v10 = vld [vmem:[#allocation5 + $0x10] sm:$0xff]  ;;  %302 = vmatprep.mubr.msk.f32.mxu0 %vm137_vm0, %v133_v9  ;;  %v398_v14 = vmov 0.0   ;;  %v134_v39 = vld [vmem:[#allocation5 + $0x8] sm:$0xff] }
  0x1d   :  { %v434_v1 = vshrl.u32 %v47_v0, 7  ;;  %v80_v8 = vadd.s32 32, %v45_v6  ;;  %305 = vmatprep.mubr.msk.f32.mxu1 %vm137_vm0, %v135_v10  ;;  %v272_v18 = vld [vmem:[%s464_s2] ss:$0 sm:$0xff]  ;;  %s399_s2 = smov [#allocation7]  }
  0x1e   :  { %v136_v40 = vld [vmem:[#allocation5 + $0x18] sm:$0xff]  ;;  %s244_s29 = sshll.u32 %s399_s2, 4  ;;  %s245_s29 = int_to_ptr.vmem [resolvable:$true] %s244_s29 }
  0x1f   :  { %v54_v2 = vadd.s32 48, %v434_v1  ;;  %v53_v3 = vadd.s32 40, %v434_v1  ;;  %v83_v4 = vsub.s32 0, %v434_v1  ;;  %v52_v7 = vadd.s32 32, %v434_v1  ;;  %s368_s30 = scalar_lea.vmem %s245_s29, 512  ;;  %p373_p11 = scmp.lt.s32.totalorder %s245_s29, %s245_s29 }
  0x20   :  { %v51_v11 = vadd.s32 24, %v434_v1  ;;  %v50_v13 = vadd.s32 16, %v434_v1  ;;  %v49_v16 = vadd.s32 8, %v434_v1  ;;  %vm59_vm14 = vcmp.eq.s32.totalorder %v434_v1, %v257_v5  ;;  %p369_p10 = scmp.ne.s32.totalorder %s245_s29, %s368_s30  ;;  %p374_p12 = scmp.lt.s32.totalorder %s368_s30, %s368_s30 }
  0x21   :  { %vm65_vm1 = vcmp.eq.s32.totalorder %v54_v2, %v257_v5  ;;  %vm64_vm2 = vcmp.eq.s32.totalorder %v53_v3, %v257_v5  ;;  %v84_v12 = vrot.slane %v80_v8, %v83_v4  ;;  %vm119_vm3 = vcmp.eq.s32.totalorder %v54_v2, 48 }
  0x22   :  { %v264_v15 = vsel %vm65_vm1, 1.0, %v398_v14  ;;  %vm63_vm4 = vcmp.eq.s32.totalorder %v52_v7, %v257_v5  ;;  %v263_v17 = vsel %vm64_vm2, 1.0, %v398_v14  ;;  %vm62_vm8 = vcmp.eq.s32.totalorder %v51_v11, %v257_v5  ;;  %p375_p13 = por %p374_p12, %p373_p11 }
  0x23   :  { %vm91_vm5 = vcmp.eq.s32.totalorder %v54_v2, %v84_v12  ;;  %vm90_vm6 = vcmp.eq.s32.totalorder %v53_v3, %v84_v12  ;;  %vm89_vm7 = vcmp.eq.s32.totalorder %v52_v7, %v84_v12  ;;  %vm88_vm9 = vcmp.eq.s32.totalorder %v51_v11, %v84_v12 }
  0x24   :  { %v271_v19 = vsel %vm91_vm5, 1.0, %v398_v14  ;;  %v270_v20 = vsel %vm90_vm6, 1.0, %v398_v14  ;;  %v262_v22 = vsel %vm63_vm4, 1.0, %v398_v14  ;;  %v269_v23 = vsel %vm89_vm7, 1.0, %v398_v14  ;;  %p376_p0 = pnand %p375_p13, %p369_p10 }
  0x25   :  { %v112_v21 = vadd.f32 %v271_v19, %v264_v15  ;;  %v111_v24 = vadd.f32 %v270_v20, %v263_v17  ;;  %vm61_vm10 = vcmp.eq.s32.totalorder %v50_v13, %v257_v5  ;;  %vm87_vm11 = vcmp.eq.s32.totalorder %v50_v13, %v84_v12 }
  0x26   :  { %v261_v26 = vsel %vm62_vm8, 1.0, %v398_v14  ;;  %v268_v27 = vsel %vm88_vm9, 1.0, %v398_v14  ;;  %v110_v28 = vadd.f32 %v269_v23, %v262_v22  ;;  %vm60_vm12 = vcmp.eq.s32.totalorder %v49_v16, %v257_v5 }
  0x27   :  { %v132_v25 = vsel %vm119_vm3, %v272_v18, %v112_v21  ;;  %vm86_vm13 = vcmp.eq.s32.totalorder %v49_v16, %v84_v12  ;;  %v260_v29 = vsel %vm61_vm10, 1.0, %v398_v14  ;;  %v267_v30 = vsel %vm87_vm11, 1.0, %v398_v14 }
  0x28   :  { %288 = vmatprep.subr.mxu0 %v132_v25  ;;  %308 = vmatprep.subr.mxu1 %v132_v25  ;;  %v109_v31 = vadd.f32 %v268_v27, %v261_v26  ;;  %vm85_vm15 = vcmp.eq.s32.totalorder %v434_v1, %v84_v12  ;;  %v259_v32 = vsel %vm60_vm12, 1.0, %v398_v14  ;;  %v266_v33 = vsel %vm86_vm13, 1.0, %v398_v14 }
  0x29   :  { %289 = vmatpush3.msra.mxu0 %v132_v25  ;;  %315 = vmatpush3.msra.mxu1 %v132_v25  ;;  %v108_v34 = vadd.f32 %v267_v30, %v260_v29  ;;  %v258_v35 = vsel %vm59_vm14, 1.0, %v398_v14  ;;  %v265_v36 = vsel %vm85_vm15, 1.0, %v398_v14  ;;  %v107_v37 = vadd.f32 %v266_v33, %v259_v32 }
  0x2a   :  { %290 = vmatprep.subr.mxu0 %v111_v24  ;;  %309 = vmatprep.subr.mxu1 %v111_v24  ;;  %v106_v38 = vadd.f32 %v265_v36, %v258_v35 }
  0x2b   :  { %291 = vmatpush3.msra.mxu0 %v111_v24  ;;  %316 = vmatpush3.msra.mxu1 %v111_v24 }
  0x2c   :  { %292 = vmatprep.subr.mxu0 %v110_v28  ;;  %310 = vmatprep.subr.mxu1 %v110_v28 }
  0x2d   :  { %293 = vmatpush3.msra.mxu0 %v110_v28  ;;  %317 = vmatpush3.msra.mxu1 %v110_v28 }
  0x2e   :  { %294 = vmatprep.subr.mxu0 %v109_v31  ;;  %311 = vmatprep.subr.mxu1 %v109_v31 }
  0x2f   :  { %295 = vmatpush3.msra.mxu0 %v109_v31  ;;  %318 = vmatpush3.msra.mxu1 %v109_v31 }
  0x30   :  { %296 = vmatprep.subr.mxu0 %v108_v34  ;;  %312 = vmatprep.subr.mxu1 %v108_v34 }
  0x31   :  { %297 = vmatpush3.msra.mxu0 %v108_v34  ;;  %319 = vmatpush3.msra.mxu1 %v108_v34 }
  0x32   :  { %298 = vmatprep.subr.mxu0 %v107_v37  ;;  %313 = vmatprep.subr.mxu1 %v107_v37 }
  0x33   :  { %299 = vmatpush3.msra.mxu0 %v107_v37  ;;  %320 = vmatpush3.msra.mxu1 %v107_v37 }
  0x34   :  { %300 = vmatprep.subr.mxu0 %v106_v38  ;;  %314 = vmatprep.subr.mxu1 %v106_v38 }
  0x35   :  { %301 = vmatpush3.msra.mxu0 %v106_v38  ;;  %321 = vmatpush3.msra.mxu1 %v106_v38 }
  0x36   :  { %303 = vmatmul.mubr.msk.f32.vlgmr.msra.gmra.mxu0 %vm137_vm0, %v134_v39  ;;  %306 = vmatmul.mubr.msk.f32.vlgmr.msra.gmra.mxu1 %vm137_vm0, %v136_v40 }
  0xf6   :  { %v304_v41 = vpop.f32.mrf.mxu0  ;;  %v307_v42 = vpop.f32.mrf.mxu1 }
  0xf7   :  { %236 = vst [vmem:[#allocation7 + $0x8] sm:$0xff] %v304_v41  ;;  %238 = vst [vmem:[#allocation7 + $0x18] sm:$0xff] %v307_v42 }
  0xf8   :  { %v216_v43 = vpop.f32.mrf.mxu0  ;;  %v226_v44 = vpop.f32.mrf.mxu1 }
  0xf9   :  { %235 = vst [vmem:[#allocation7] sm:$0xff] %v216_v43  ;;  %237 = vst [vmem:[#allocation7 + $0x10] sm:$0xff] %v226_v44 }
  0xfa   :  { %379 = shalt.err (!%p376_p0)
}
  0xfb   :  { %250 = dma.vmem_to_hbm [thread:$0]  %s245_s29, 512, %s466_s4, [#allocation4], %s396_s24, %s396_s24, %s397_s25  }
  0xfc   :  { %392 = dma.done.wait [#allocation4], 512  }
  0xfd   :  { %393 = vsyncadd [#allocation4], 4294966784 }
  0xfe   :  { %254 = vsyncpa [#allocation3], 1 }
  0xff   :  { %255 = vsyncpa [#allocation6], 1 }
 0x100   :  { %256 = vsyncpa [#allocation4], 1 }

</bundles_post_ra>
